<compile_context>
chip_gen: v6e
topology: v6e:2x2x1
jax: 0.10.0
libtpu: 0.0.40
codegen_flags: <defaults>
</compile_context>

<pallas_src>
import jax
import jax.numpy as jnp
from jax.experimental import pallas as pl
from jax.experimental.pallas import tpu as pltpu


# ----------------------------------------------------------------------------
# helpers
# ----------------------------------------------------------------------------
def _round_up(x, m):
    return ((x + m - 1) // m) * m


def _pad2d(x, rows, cols):
    r, c = x.shape
    if r == rows and c == cols:
        return x
    return jnp.pad(x, ((0, rows - r), (0, cols - c)))


# Graphs whose padded A comfortably fits in VMEM run the single fused
# two-layer kernel (A read once).  Conservative threshold so the monolithic
# in-kernel matmuls stay tiny on every generation.
_FUSED_MAX_N_PAD = 512

# Keep the dense feature operand M resident in VMEM while its (double-buffered)
# footprint stays under this budget; otherwise fall back to streaming per-k.
_M_RESIDENT_BYTES = 8 * 1024 * 1024

# Actual usage here is <= ~8 MiB; 32 MiB is safe on v5e/v6e/v7x.  Raise toward
# 48 MiB (v7x) / ~100 MiB (v5e/v6e) if resident-A fusion for larger graphs is
# added.
_VMEM_LIMIT = 32 * 1024 * 1024


def _pick_tiles(n_pad):
    """Row tile (tile_m) and contraction tile (tile_k) for the aggregation grid."""
    tile_m = 128
    for t in (512, 256):
        if n_pad % t == 0:
            tile_m = t
            break
    # Prefer an even number of row tiles so the "parallel" row axis shards
    # evenly across the two TensorCores on v7x.
    if tile_m >= 256 and (n_pad // tile_m) > 1 and (n_pad // tile_m) % 2 == 1:
        tile_m //= 2
    tile_k = 128
    for t in (2048, 1024, 512, 256):
        if n_pad % t == 0:
            tile_k = t
            break
    return tile_m, tile_k


# ----------------------------------------------------------------------------
# fused two-layer kernel (small graphs: A resident, read from HBM once)
# ----------------------------------------------------------------------------
def _fused_two_layer_kernel(a_ref, x_ref, w0_ref, b0_ref, w1_ref, b1_ref, o_ref):
    a = a_ref[...]
    ax = jnp.dot(a, x_ref[...], preferred_element_type=jnp.float32)
    h = jnp.maximum(
        jnp.dot(ax.astype(jnp.bfloat16), w0_ref[...],
                preferred_element_type=jnp.float32) + b0_ref[...],
        0.0,
    ).astype(jnp.bfloat16)
    ah = jnp.dot(a, h, preferred_element_type=jnp.float32)
    z = jnp.maximum(
        jnp.dot(ah.astype(jnp.bfloat16), w1_ref[...],
                preferred_element_type=jnp.float32) + b1_ref[...],
        0.0,
    )
    o_ref[...] = z.astype(o_ref.dtype)


def _gcn_fused(a_pad, x_pad, w0, b0, w1, b1):
    n_pad, f_in_pad = x_pad.shape
    h_pad = _round_up(w0.shape[1], 128)
    f_out_pad = _round_up(w1.shape[1], 128)

    w0_p = _pad2d(w0.astype(jnp.float32), f_in_pad, h_pad).astype(jnp.bfloat16)
    w1_p = _pad2d(w1.astype(jnp.float32), h_pad, f_out_pad).astype(jnp.bfloat16)
    b0_p = _pad2d(jnp.reshape(b0, (1, -1)).astype(jnp.float32), 1, h_pad)
    b1_p = _pad2d(jnp.reshape(b1, (1, -1)).astype(jnp.float32), 1, f_out_pad)

    def full(shape):
        return pl.BlockSpec(shape, lambda i: (0, 0))

    return pl.pallas_call(
        _fused_two_layer_kernel,
        out_shape=jax.ShapeDtypeStruct((n_pad, f_out_pad), jnp.float32),
        grid_spec=pltpu.PrefetchScalarGridSpec(
            num_scalar_prefetch=0,
            grid=(1,),
            in_specs=[
                full((n_pad, n_pad)),
                full((n_pad, f_in_pad)),
                full((f_in_pad, h_pad)),
                full((1, h_pad)),
                full((h_pad, f_out_pad)),
                full((1, f_out_pad)),
            ],
            out_specs=full((n_pad, f_out_pad)),
        ),
        compiler_params=pltpu.CompilerParams(
            dimension_semantics=("arbitrary",),
            vmem_limit_bytes=_VMEM_LIMIT,
        ),
    )(a_pad, x_pad, w0_p, b0_p, w1_p, b1_p)


# ----------------------------------------------------------------------------
# tiled aggregation kernel:  relu((A @ M) @ W + b)
#   grid = (row_tiles, k_tiles); K last / "arbitrary"; f32 VMEM accumulator.
#   M is either fully VMEM-resident (sliced by k in-kernel) or streamed per k.
# ----------------------------------------------------------------------------
def _make_agg_kernel(tile_k, m_resident):
    def kernel(a_ref, m_ref, w_ref, b_ref, o_ref, acc_ref):
        k = pl.program_id(1)

        @pl.when(k == 0)
        def _init():
            acc_ref[...] = jnp.zeros_like(acc_ref)

        if m_resident:
            off = pl.multiple_of(k * tile_k, tile_k)
            m_blk = m_ref[pl.ds(off, tile_k), :]
        else:
            m_blk = m_ref[...]

        # hot K loop: MXU only (bf16 x bf16 -> f32 accumulate)
        acc_ref[...] += jnp.dot(a_ref[...], m_blk,
                                preferred_element_type=jnp.float32)

        @pl.when(k == pl.num_programs(1) - 1)
        def _finalize():
            h = jnp.dot(acc_ref[...].astype(jnp.bfloat16), w_ref[...],
                        preferred_element_type=jnp.float32)
            o_ref[...] = jnp.maximum(h + b_ref[...], 0.0).astype(o_ref.dtype)

    return kernel


def _gcn_layer_tiled(a_pad, m_bf16, w, b, *, tile_m, tile_k, out_dtype):
    """relu((A @ M) @ W + b); A padded bf16, M padded bf16, output padded."""
    n_pad = a_pad.shape[0]
    c_pad = m_bf16.shape[1]
    f_out_pad = _round_up(w.shape[1], 128)

    w_pad = _pad2d(w.astype(jnp.float32), c_pad, f_out_pad).astype(jnp.bfloat16)
    b_pad = _pad2d(jnp.reshape(b, (1, -1)).astype(jnp.float32), 1, f_out_pad)

    m_resident = 2 * n_pad * c_pad * 2 <= _M_RESIDENT_BYTES
    if m_resident:
        m_spec = pl.BlockSpec((n_pad, c_pad), lambda i, k: (0, 0))
    else:
        m_spec = pl.BlockSpec((tile_k, c_pad), lambda i, k: (k, 0))

    grid = (n_pad // tile_m, n_pad // tile_k)

    return pl.pallas_call(
        _make_agg_kernel(tile_k, m_resident),
        out_shape=jax.ShapeDtypeStruct((n_pad, f_out_pad), out_dtype),
        grid_spec=pltpu.PrefetchScalarGridSpec(
            num_scalar_prefetch=0,
            grid=grid,
            in_specs=[
                pl.BlockSpec((tile_m, tile_k), lambda i, k: (i, k)),
                m_spec,
                pl.BlockSpec((c_pad, f_out_pad), lambda i, k: (0, 0)),
                pl.BlockSpec((1, f_out_pad), lambda i, k: (0, 0)),
            ],
            out_specs=pl.BlockSpec((tile_m, f_out_pad), lambda i, k: (i, 0)),
            scratch_shapes=[pltpu.VMEM((tile_m, c_pad), jnp.float32)],
        ),
        compiler_params=pltpu.CompilerParams(
            dimension_semantics=("parallel", "arbitrary"),
            vmem_limit_bytes=_VMEM_LIMIT,
        ),
    )(a_pad, m_bf16, w_pad, b_pad)


# ----------------------------------------------------------------------------
# parameters + forward (mirrors GCNBase, eval mode)
# ----------------------------------------------------------------------------
def xavier_normal(key, shape):
    fan_in, fan_out = shape[0], shape[1]
    std = jnp.sqrt(2.0 / (fan_in + fan_out))
    return (jax.random.normal(key, shape, dtype=jnp.float32) * std).astype(jnp.float32)


class GCNBaseParams:
    """Deterministic parameter construction mirroring GCNBase.__init__."""

    def __init__(self, key, input_features, output_features, hidden_size, bias):
        k0, k1, k2, k3 = jax.random.split(key, 4)
        self.weight0 = xavier_normal(k0, (input_features, hidden_size))
        self.weight1 = xavier_normal(k1, (hidden_size, output_features))
        self.bias_flags = bias
        if bias[0]:
            self.bias0 = xavier_normal(k2, (1, hidden_size))
        else:
            self.bias0 = jnp.zeros((1, hidden_size), jnp.float32)
        if bias[1]:
            self.bias1 = xavier_normal(k3, (1, output_features))
        else:
            self.bias1 = jnp.zeros((1, output_features), jnp.float32)


def gcn_forward(params, X, A):
    """Forward pass of GCNBase (eval mode: dropout = identity)."""
    n = A.shape[0]
    f_out = params.weight1.shape[1]
    n_pad = _round_up(n, 128)
    f_in_pad = _round_up(X.shape[1], 128)

    a_pad = _pad2d(A.astype(jnp.float32), n_pad, n_pad).astype(jnp.bfloat16)
    x_pad = _pad2d(X.astype(jnp.float32), n_pad, f_in_pad).astype(jnp.bfloat16)

    if n_pad <= _FUSED_MAX_N_PAD:
        # A stays VMEM-resident for both layers -> single HBM read of A.
        z = _gcn_fused(a_pad, x_pad, params.weight0, params.bias0,
                       params.weight1, params.bias1)
    else:
        tile_m, tile_k = _pick_tiles(n_pad)
        # layer 0: relu(A @ X @ W0 + b0) emitted padded bf16 (stays lane-dense,
        # no slice/re-pad/re-cast round trip before layer 1)
        h = _gcn_layer_tiled(a_pad, x_pad, params.weight0, params.bias0,
                             tile_m=tile_m, tile_k=tile_k,
                             out_dtype=jnp.bfloat16)
        # dropout -> identity (eval)
        # layer 1: relu(A @ H @ W1 + b1)
        z = _gcn_layer_tiled(a_pad, h, params.weight1, params.bias1,
                             tile_m=tile_m, tile_k=tile_k,
                             out_dtype=jnp.float32)
        # dropout -> identity (eval)
    return z[:n, :f_out]


# ----------------------------------------------------------------------------
# demo / correctness check
# ----------------------------------------------------------------------------
def _make_graph(key, n):
    kx, ka = jax.random.split(key)
    x = jax.random.normal(kx, (n, 8), dtype=jnp.float32)
    a_raw = (jax.random.uniform(ka, (n, n)) > 0.7).astype(jnp.float32)
    a_raw = jnp.maximum(a_raw, a_raw.T) + jnp.eye(n, dtype=jnp.float32)
    a = a_raw / jnp.sum(a_raw, axis=1, keepdims=True)
    return x, a


if __name__ == "__main__":
    key = jax.random.PRNGKey(0)
    k_param, *k_graphs = jax.random.split(key, 5)

    F_IN, HID, F_OUT = 8, 32, 8
    params = GCNBaseParams(k_param, F_IN, F_OUT, HID, bias=[True, True])

    def reference(X, A):
        h_ref = jnp.maximum(A @ X @ params.weight0 + params.bias0, 0.0)
        return jnp.maximum(A @ h_ref @ params.weight1 + params.bias1, 0.0)

    fwd = jax.jit(lambda X, A: gcn_forward(params, X, A))

    # N=16   -> fused single-kernel path (A read once, fully VMEM-resident)
    # N=640  -> tiled path, n_pad=640,  tile_m=tile_k=128, resident M
    # N=1500 -> tiled path, n_pad=1536, tile_m=256, tile_k=512 (wide K block)
    # N=2048 -> tiled path, n_pad=2048, tile_m=512, tile_k=2048 (single K step)
    for n, kg in zip((16, 640, 1500, 2048), k_graphs):
        X, A = _make_graph(kg, n)
        Z = fwd(X, A)
        jax.block_until_ready(Z)
        Z_ref = reference(X, A)
        assert Z.shape == (n, F_OUT)
        # bf16 matmul inputs -> loosened tolerance (expected precision change)
        assert jnp.allclose(Z, Z_ref, atol=5e-2, rtol=5e-2), (
            n, float(jnp.max(jnp.abs(Z - Z_ref))))

    print("KERNEL_OK")
</pallas_src>

<mosaic_0001>
module attributes {stable_mosaic.version = 11 : i64} {
  func.func @_fused_two_layer_kernel(%arg0: i32, %arg1: memref<128x128xbf16, #tpu.memory_space<vmem>>, %arg2: memref<128x128xbf16, #tpu.memory_space<vmem>>, %arg3: memref<128x128xbf16, #tpu.memory_space<vmem>>, %arg4: memref<1x128xf32, #tpu.memory_space<vmem>>, %arg5: memref<128x128xbf16, #tpu.memory_space<vmem>>, %arg6: memref<1x128xf32, #tpu.memory_space<vmem>>, %arg7: memref<128x128xf32, #tpu.memory_space<vmem>>) attributes {dimension_semantics = [#tpu.dimension_semantics<arbitrary>], iteration_bounds = array<i64: 1>, scalar_prefetch = 0 : i64, scratch_operands = 0 : i64, tpu.core_type = #tpu.core_type<tc>, window_params = [{pipeline_mode = #tpu.pipeline_mode<synchronous>, transform_indices = @transform_0, window_bounds = array<i64: 128, 128>}, {pipeline_mode = #tpu.pipeline_mode<synchronous>, transform_indices = @transform_1, window_bounds = array<i64: 128, 128>}, {pipeline_mode = #tpu.pipeline_mode<synchronous>, transform_indices = @transform_2, window_bounds = array<i64: 128, 128>}, {pipeline_mode = #tpu.pipeline_mode<synchronous>, transform_indices = @transform_3, window_bounds = array<i64: 1, 128>}, {pipeline_mode = #tpu.pipeline_mode<synchronous>, transform_indices = @transform_4, window_bounds = array<i64: 128, 128>}, {pipeline_mode = #tpu.pipeline_mode<synchronous>, transform_indices = @transform_5, window_bounds = array<i64: 1, 128>}, {pipeline_mode = #tpu.pipeline_mode<synchronous>, transform_indices = @transform_6, window_bounds = array<i64: 128, 128>}]} {
    %c0 = arith.constant 0 : index
    %c0_0 = arith.constant 0 : index
    %0 = vector.load %arg1[%c0, %c0_0] : memref<128x128xbf16, #tpu.memory_space<vmem>>, vector<128x128xbf16>
    %c0_1 = arith.constant 0 : index
    %c0_2 = arith.constant 0 : index
    %1 = vector.load %arg2[%c0_1, %c0_2] : memref<128x128xbf16, #tpu.memory_space<vmem>>, vector<128x128xbf16>
    %cst = arith.constant dense<0.000000e+00> : vector<128x128xf32>
    %2 = tpu.matmul %0, %1, %cst {dimension_numbers = #tpu.dot_dimension_numbers<[1], [0], [0], [1], [0, 0, 1, 1], [], []>} : vector<128x128xbf16>, vector<128x128xbf16>, vector<128x128xf32> -> vector<128x128xf32>
    %3 = arith.truncf %2 : vector<128x128xf32> to vector<128x128xbf16>
    %c0_3 = arith.constant 0 : index
    %c0_4 = arith.constant 0 : index
    %4 = vector.load %arg3[%c0_3, %c0_4] : memref<128x128xbf16, #tpu.memory_space<vmem>>, vector<128x128xbf16>
    %cst_5 = arith.constant dense<0.000000e+00> : vector<128x128xf32>
    %5 = tpu.matmul %3, %4, %cst_5 {dimension_numbers = #tpu.dot_dimension_numbers<[1], [0], [0], [1], [0, 0, 1, 1], [], []>} : vector<128x128xbf16>, vector<128x128xbf16>, vector<128x128xf32> -> vector<128x128xf32>
    %c0_6 = arith.constant 0 : index
    %c0_7 = arith.constant 0 : index
    %6 = vector.load %arg4[%c0_6, %c0_7] : memref<1x128xf32, #tpu.memory_space<vmem>>, vector<1x128xf32>
    %7 = vector.broadcast %6 : vector<1x128xf32> to vector<128x128xf32>
    %8 = arith.addf %5, %7 : vector<128x128xf32>
    %cst_8 = arith.constant 0.000000e+00 : f32
    %9 = vector.broadcast %cst_8 : f32 to vector<128x128xf32>
    %10 = arith.maximumf %8, %9 : vector<128x128xf32>
    %11 = arith.truncf %10 : vector<128x128xf32> to vector<128x128xbf16>
    %cst_9 = arith.constant dense<0.000000e+00> : vector<128x128xf32>
    %12 = tpu.matmul %0, %11, %cst_9 {dimension_numbers = #tpu.dot_dimension_numbers<[1], [0], [0], [1], [0, 0, 1, 1], [], []>} : vector<128x128xbf16>, vector<128x128xbf16>, vector<128x128xf32> -> vector<128x128xf32>
    %13 = arith.truncf %12 : vector<128x128xf32> to vector<128x128xbf16>
    %c0_10 = arith.constant 0 : index
    %c0_11 = arith.constant 0 : index
    %14 = vector.load %arg5[%c0_10, %c0_11] : memref<128x128xbf16, #tpu.memory_space<vmem>>, vector<128x128xbf16>
    %cst_12 = arith.constant dense<0.000000e+00> : vector<128x128xf32>
    %15 = tpu.matmul %13, %14, %cst_12 {dimension_numbers = #tpu.dot_dimension_numbers<[1], [0], [0], [1], [0, 0, 1, 1], [], []>} : vector<128x128xbf16>, vector<128x128xbf16>, vector<128x128xf32> -> vector<128x128xf32>
    %c0_13 = arith.constant 0 : index
    %c0_14 = arith.constant 0 : index
    %16 = vector.load %arg6[%c0_13, %c0_14] : memref<1x128xf32, #tpu.memory_space<vmem>>, vector<1x128xf32>
    %17 = vector.broadcast %16 : vector<1x128xf32> to vector<128x128xf32>
    %18 = arith.addf %15, %17 : vector<128x128xf32>
    %cst_15 = arith.constant 0.000000e+00 : f32
    %19 = vector.broadcast %cst_15 : f32 to vector<128x128xf32>
    %20 = arith.maximumf %18, %19 : vector<128x128xf32>
    %c0_16 = arith.constant 0 : index
    %c0_17 = arith.constant 0 : index
    %21 = vector.load %arg7[%c0_16, %c0_17] : memref<128x128xf32, #tpu.memory_space<vmem>>, vector<128x128xf32>
    tpu.vector_store %arg7[%c0_16, %c0_17], %20 {strides = array<i32>} : memref<128x128xf32, #tpu.memory_space<vmem>>, vector<128x128xf32>,
    return
  }
  func.func @transform_0(%arg0: i32) -> (i32, i32) {
    %c0_i32 = arith.constant 0 : i32
    %c0_i32_0 = arith.constant 0 : i32
    %c0_i32_1 = arith.constant 0 : i32
    return %c0_i32, %c0_i32_0 : i32, i32
  }
  func.func @transform_1(%arg0: i32) -> (i32, i32) {
    %c0_i32 = arith.constant 0 : i32
    %c0_i32_0 = arith.constant 0 : i32
    %c0_i32_1 = arith.constant 0 : i32
    return %c0_i32, %c0_i32_0 : i32, i32
  }
  func.func @transform_2(%arg0: i32) -> (i32, i32) {
    %c0_i32 = arith.constant 0 : i32
    %c0_i32_0 = arith.constant 0 : i32
    %c0_i32_1 = arith.constant 0 : i32
    return %c0_i32, %c0_i32_0 : i32, i32
  }
  func.func @transform_3(%arg0: i32) -> (i32, i32) {
    %c0_i32 = arith.constant 0 : i32
    %c0_i32_0 = arith.constant 0 : i32
    %c0_i32_1 = arith.constant 0 : i32
    return %c0_i32, %c0_i32_0 : i32, i32
  }
  func.func @transform_4(%arg0: i32) -> (i32, i32) {
    %c0_i32 = arith.constant 0 : i32
    %c0_i32_0 = arith.constant 0 : i32
    %c0_i32_1 = arith.constant 0 : i32
    return %c0_i32, %c0_i32_0 : i32, i32
  }
  func.func @transform_5(%arg0: i32) -> (i32, i32) {
    %c0_i32 = arith.constant 0 : i32
    %c0_i32_0 = arith.constant 0 : i32
    %c0_i32_1 = arith.constant 0 : i32
    return %c0_i32, %c0_i32_0 : i32, i32
  }
  func.func @transform_6(%arg0: i32) -> (i32, i32) {
    %c0_i32 = arith.constant 0 : i32
    %c0_i32_0 = arith.constant 0 : i32
    %c0_i32_1 = arith.constant 0 : i32
    return %c0_i32, %c0_i32_0 : i32, i32
  }
}

</mosaic_0001>

<bundles_post_ra>
// kernel: _lambda_.1
= control target key start
LH: loop header
LB: loop body
LE: loop exit
PB: predicated region body
PF: predicated region fallthrough
CT: control target
= control target key end

     0   :  { %s1229_s1 = inlined_call_operand.vmem [shape: bf16[128,128], index: 1, kind: input, shape index: {}]   ;;  %s1230_s0 = inlined_call_operand.vmem [shape: bf16[128,128], index: 0, kind: input, shape index: {}]   ;;  %s1231_s2 = inlined_call_operand.vmem [shape: bf16[128,128], index: 2, kind: input, shape index: {}]   ;;  %s1232_s4 = inlined_call_operand.vmem [shape: bf16[128,128], index: 4, kind: input, shape index: {}]   ;;  %s1233_s3 = inlined_call_operand.vmem [shape: f32[1,128], index: 3, kind: input, shape index: {}]   ;;  %s1234_s5 = inlined_call_operand.vmem [shape: f32[1,128], index: 5, kind: input, shape index: {}]   ;;  %s1235_s6 = inlined_call_operand.vmem [shape: f32[128,128], index: 6, kind: output, shape index: {}]  }
   0x1   :  { %v984_v0 = vld [vmem:[%s1229_s1 + $0x38] sm:$0xff]   ;;  %v985_v1 = vld [vmem:[%s1229_s1 + $0x30] sm:$0xff]   ;;  %v986_v2 = vld [vmem:[%s1229_s1 + $0x28] sm:$0xff]  }
   0x2   :  { %856 = vmatprep.subr.bf16.mxu0 %v984_v0  ;;  %v987_v3 = vld [vmem:[%s1229_s1 + $0x20] sm:$0xff]   ;;  %v988_v5 = vld [vmem:[%s1229_s1 + $0x18] sm:$0xff]   ;;  %v989_v6 = vld [vmem:[%s1229_s1 + $0x10] sm:$0xff]  }
   0x3   :  { %857 = vmatpush3.bf16.msra.mxu0 %v984_v0  ;;  %v992_v4 = vld [vmem:[%s1230_s0] sm:$0xff]   ;;  %v1000_v7 = vld [vmem:[%s1231_s2 + $0x38] sm:$0xff]   ;;  %v1001_v8 = vld [vmem:[%s1231_s2 + $0x30] sm:$0xff]  }
   0x4   :  { %858 = vmatprep.subr.bf16.mxu0 %v985_v1  ;;  %872 = vmatprep.mubr.bf16.mxu0 %v992_v4  ;;  %v990_v9 = vld [vmem:[%s1229_s1 + $0x8] sm:$0xff]   ;;  %v991_v11 = vld [vmem:[%s1229_s1] sm:$0xff]   ;;  %v1004_v13 = vld [vmem:[%s1231_s2 + $0x18] sm:$0xff]  }
   0x5   :  { %888 = vmatprep.subr.bf16.mxu1 %v1000_v7  ;;  %v1002_v10 = vld [vmem:[%s1231_s2 + $0x28] sm:$0xff]   ;;  %v1003_v12 = vld [vmem:[%s1231_s2 + $0x20] sm:$0xff]   ;;  %v1101_v15 = vld [vmem:[%s1230_s0 + $0x10] sm:$0xff]  }
   0x6   :  { %889 = vmatpush3.bf16.msra.mxu1 %v1000_v7  ;;  %v1096_v14 = vld [vmem:[%s1230_s0 + $0x8] sm:$0xff]   ;;  %v1005_v16 = vld [vmem:[%s1231_s2 + $0x10] sm:$0xff]   ;;  %v1111_v17 = vld [vmem:[%s1230_s0 + $0x18] sm:$0xff]  }
   0x7   :  { %859 = vmatpush3.bf16.msra.mxu0 %v985_v1  ;;  %890 = vmatprep.subr.bf16.mxu1 %v1001_v8  ;;  %v1116_v18 = vld [vmem:[%s1230_s0 + $0x20] sm:$0xff]   ;;  %v1123_v19 = vld [vmem:[%s1230_s0 + $0x28] sm:$0xff]   ;;  %v1128_v20 = vld [vmem:[%s1230_s0 + $0x30] sm:$0xff]  }
   0x8   :  { %860 = vmatprep.subr.bf16.mxu0 %v986_v2  ;;  %v1135_v21 = vld [vmem:[%s1230_s0 + $0x38] sm:$0xff]   ;;  %v1006_v22 = vld [vmem:[%s1231_s2 + $0x8] sm:$0xff]   ;;  %v1007_v23 = vld [vmem:[%s1231_s2] sm:$0xff]  }
   0x9   :  { %v1008_v48 = vld [vmem:[%s1232_s4 + $0x38] sm:$0xff]   ;;  %v1009_v49 = vld [vmem:[%s1232_s4 + $0x30] sm:$0xff]   ;;  %v1010_v50 = vld [vmem:[%s1232_s4 + $0x28] sm:$0xff]  }
   0xa   :  { %891 = vmatpush3.bf16.msra.mxu1 %v1001_v8  ;;  %v1011_v51 = vld [vmem:[%s1232_s4 + $0x20] sm:$0xff]   ;;  %v1012_v52 = vld [vmem:[%s1232_s4 + $0x18] sm:$0xff]   ;;  %v1013_v53 = vld [vmem:[%s1232_s4 + $0x10] sm:$0xff]  }
   0xb   :  { %861 = vmatpush3.bf16.msra.mxu0 %v986_v2  ;;  %892 = vmatprep.subr.bf16.mxu1 %v1002_v10 }
   0xc   :  { %862 = vmatprep.subr.bf16.mxu0 %v987_v3 }
   0xe   :  { %893 = vmatpush3.bf16.msra.mxu1 %v1002_v10 }
   0xf   :  { %863 = vmatpush3.bf16.msra.mxu0 %v987_v3  ;;  %894 = vmatprep.subr.bf16.mxu1 %v1003_v12  ;;  %v774_v3 = vld [vmem:[%s1233_s3] ss:$0 sm:$0xff] }
  0x10   :  { %864 = vmatprep.subr.bf16.mxu0 %v988_v5 }
  0x12   :  { %895 = vmatpush3.bf16.msra.mxu1 %v1003_v12 }
  0x13   :  { %865 = vmatpush3.bf16.msra.mxu0 %v988_v5  ;;  %896 = vmatprep.subr.bf16.mxu1 %v1004_v13 }
  0x14   :  { %866 = vmatprep.subr.bf16.mxu0 %v989_v6 }
  0x16   :  { %897 = vmatpush3.bf16.msra.mxu1 %v1004_v13 }
  0x17   :  { %867 = vmatpush3.bf16.msra.mxu0 %v989_v6  ;;  %898 = vmatprep.subr.bf16.mxu1 %v1005_v16 }
  0x18   :  { %868 = vmatprep.subr.bf16.mxu0 %v990_v9 }
  0x1a   :  { %899 = vmatpush3.bf16.msra.mxu1 %v1005_v16 }
  0x1b   :  { %869 = vmatpush3.bf16.msra.mxu0 %v990_v9  ;;  %900 = vmatprep.subr.bf16.mxu1 %v1006_v22 }
  0x1c   :  { %870 = vmatprep.subr.bf16.mxu0 %v991_v11 }
  0x1e   :  { %901 = vmatpush3.bf16.msra.mxu1 %v1006_v22 }
  0x1f   :  { %871 = vmatpush3.bf16.msra.mxu0 %v991_v11  ;;  %902 = vmatprep.subr.bf16.mxu1 %v1007_v23 }
  0x22   :  { %873 = vmatmul.mubr.bf16.vlgmr.msra.gmra.mxu0 %v1096_v14  ;;  %903 = vmatpush3.bf16.msra.mxu1 %v1007_v23 }
  0x23   :  { %876 = vmatprep.mubr.bf16.mxu0 %v1101_v15  ;;  %952 = vmatprep.subr.bf16.mxu1 %v1008_v48 }
  0x2a   :  { %877 = vmatmul.mubr.bf16.gmra.mxu0 %v1111_v17 }
  0x2b   :  { %880 = vmatprep.mubr.bf16.mxu0 %v1116_v18 }
  0x32   :  { %881 = vmatmul.mubr.bf16.gmra.mxu0 %v1123_v19 }
  0x33   :  { %884 = vmatprep.mubr.bf16.mxu0 %v1128_v20 }
  0x3a   :  { %885 = vmatmul.mubr.bf16.gmra.mxu0 %v1135_v21 }
  0x3b   :  { %936 = vmatprep.mubr.bf16.mxu0 %v992_v4 }
  0xe2   :  { %v874_v24 = vpop.f32.mrf.mxu0 }
  0xe4   :  { %v186_v25 = vpop.f32.mrf.mxu0 }
  0xe6   :  { %v875_v26 = vpop.f32.mrf.mxu0 }
  0xe7   :  { %v250_v29 = vpack.c.bf16 %v875_v26, %v874_v24 }
  0xe8   :  { %v189_v27 = vpop.f32.mrf.mxu0 }
  0xe9   :  { %v249_v28 = vpack.c.bf16 %v189_v27, %v186_v25 }
  0xea   :  { %v878_v30 = vpop.f32.mrf.mxu0 }
  0xeb   :  { %904 = vmatprep.mubr.bf16.mxu1 %v249_v28 }
  0xec   :  { %v202_v31 = vpop.f32.mrf.mxu0  ;;  %905 = vmatmul.mubr.bf16.vlgmr.msra.gmra.mxu1 %v250_v29 }
  0xed   :  { %953 = vmatpush3.bf16.msra.mxu1 %v1008_v48 }
  0xee   :  { %v879_v32 = vpop.f32.mrf.mxu0  ;;  %954 = vmatprep.subr.bf16.mxu1 %v1009_v49 }
  0xef   :  { %v252_v35 = vpack.c.bf16 %v879_v32, %v878_v30 }
  0xf0   :  { %v205_v33 = vpop.f32.mrf.mxu0 }
  0xf1   :  { %v251_v34 = vpack.c.bf16 %v205_v33, %v202_v31  ;;  %955 = vmatpush3.bf16.msra.mxu1 %v1009_v49 }
  0xf2   :  { %v882_v36 = vpop.f32.mrf.mxu0  ;;  %956 = vmatprep.subr.bf16.mxu1 %v1010_v50 }
  0xf3   :  { %908 = vmatprep.mubr.bf16.mxu1 %v251_v34 }
  0xf4   :  { %v218_v37 = vpop.f32.mrf.mxu0  ;;  %909 = vmatmul.mubr.bf16.gmra.mxu1 %v252_v35 }
  0xf5   :  { %957 = vmatpush3.bf16.msra.mxu1 %v1010_v50 }
  0xf6   :  { %v883_v38 = vpop.f32.mrf.mxu0  ;;  %958 = vmatprep.subr.bf16.mxu1 %v1011_v51 }
  0xf7   :  { %v254_v41 = vpack.c.bf16 %v883_v38, %v882_v36 }
  0xf8   :  { %v221_v39 = vpop.f32.mrf.mxu0 }
  0xf9   :  { %v253_v40 = vpack.c.bf16 %v221_v39, %v218_v37  ;;  %959 = vmatpush3.bf16.msra.mxu1 %v1011_v51 }
  0xfa   :  { %v886_v42 = vpop.f32.mrf.mxu0  ;;  %960 = vmatprep.subr.bf16.mxu1 %v1012_v52 }
  0xfb   :  { %912 = vmatprep.mubr.bf16.mxu1 %v253_v40 }
  0xfc   :  { %v234_v43 = vpop.f32.mrf.mxu0  ;;  %913 = vmatmul.mubr.bf16.gmra.mxu1 %v254_v41 }
  0xfd   :  { %961 = vmatpush3.bf16.msra.mxu1 %v1012_v52 }
  0xfe   :  { %v887_v44 = vpop.f32.mrf.mxu0  ;;  %962 = vmatprep.subr.bf16.mxu1 %v1013_v53 }
  0xff   :  { %v256_v47 = vpack.c.bf16 %v887_v44, %v886_v42 }
 0x100   :  { %v237_v45 = vpop.f32.mrf.mxu0 }
 0x101   :  { %v255_v46 = vpack.c.bf16 %v237_v45, %v234_v43  ;;  %963 = vmatpush3.bf16.msra.mxu1 %v1013_v53 }
 0x103   :  { %916 = vmatprep.mubr.bf16.mxu1 %v255_v46 }
 0x104   :  { %917 = vmatmul.mubr.bf16.gmra.mxu1 %v256_v47 }
 0x1ac   :  { %v906_v54 = vpop.f32.mrf.mxu1 }
 0x1ad   :  { %v371_v43 = vadd.f32 %v906_v54, %v774_v3  ;;  %v1014_v54 = vld [vmem:[%s1232_s4 + $0x8] sm:$0xff]  }
 0x1ae   :  { %v362_v55 = vpop.f32.mrf.mxu1  ;;  %964 = vmatprep.subr.bf16.mxu1 %v1014_v54 }
 0x1af   :  { %v427_v48 = vmax.f32 %v371_v43, 0.0  ;;  %v363_v49 = vadd.f32 %v774_v3, %v362_v55  ;;  %965 = vmatpush3.bf16.msra.mxu1 %v1014_v54 }
 0x1b0   :  { %v907_v56 = vpop.f32.mrf.mxu1 }
 0x1b1   :  { %v374_v40 = vadd.f32 %v907_v56, %v774_v3  ;;  %v425_v52 = vmax.f32 %v363_v49, 0.0 }
 0x1b2   :  { %v365_v57 = vpop.f32.mrf.mxu1 }
 0x1b3   :  { %v428_v45 = vmax.f32 %v374_v40, 0.0  ;;  %v366_v46 = vadd.f32 %v774_v3, %v365_v57 }
 0x1b4   :  { %v910_v58 = vpop.f32.mrf.mxu1 }
 0x1b5   :  { %v387_v33 = vadd.f32 %v910_v58, %v774_v3  ;;  %v442_v50 = vpack.c.bf16 %v428_v45, %v427_v48  ;;  %v426_v51 = vmax.f32 %v366_v46, 0.0 }
 0x1b6   :  { %v378_v59 = vpop.f32.mrf.mxu1 }
 0x1b7   :  { %v431_v38 = vmax.f32 %v387_v33, 0.0  ;;  %v379_v39 = vadd.f32 %v774_v3, %v378_v59  ;;  %v441_v53 = vpack.c.bf16 %v426_v51, %v425_v52 }
 0x1b8   :  { %v911_v60 = vpop.f32.mrf.mxu1 }
 0x1b9   :  { %v390_v30 = vadd.f32 %v911_v60, %v774_v3  ;;  %v429_v44 = vmax.f32 %v379_v39, 0.0 }
 0x1ba   :  { %v381_v61 = vpop.f32.mrf.mxu1 }
 0x1bb   :  { %v432_v35 = vmax.f32 %v390_v30, 0.0  ;;  %v382_v36 = vadd.f32 %v774_v3, %v381_v61 }
 0x1bc   :  { %v914_v62 = vpop.f32.mrf.mxu1 }
 0x1bd   :  { %v403_v16 = vadd.f32 %v914_v62, %v774_v3  ;;  %v444_v41 = vpack.c.bf16 %v432_v35, %v431_v38  ;;  %v430_v42 = vmax.f32 %v382_v36, 0.0 }
 0x1be   :  { %v394_v63 = vpop.f32.mrf.mxu1 }
 0x1bf   :  { %v435_v28 = vmax.f32 %v403_v16, 0.0  ;;  %v395_v29 = vadd.f32 %v774_v3, %v394_v63  ;;  %v443_v47 = vpack.c.bf16 %v430_v42, %v429_v44 }
 0x1c0   :  { %v915_v0 = vpop.f32.mrf.mxu1 }
 0x1c1   :  { %v406_v10 = vadd.f32 %v915_v0, %v774_v3  ;;  %v433_v34 = vmax.f32 %v395_v29, 0.0 }
 0x1c2   :  { %v397_v1 = vpop.f32.mrf.mxu1 }
 0x1c3   :  { %v436_v25 = vmax.f32 %v406_v10, 0.0  ;;  %v398_v26 = vadd.f32 %v774_v3, %v397_v1 }
 0x1c4   :  { %v918_v2 = vpop.f32.mrf.mxu1 }
 0x1c5   :  { %v419_v5 = vadd.f32 %v918_v2, %v774_v3  ;;  %v446_v31 = vpack.c.bf16 %v436_v25, %v435_v28  ;;  %v434_v32 = vmax.f32 %v398_v26, 0.0 }
 0x1c6   :  { %v410_v4 = vpop.f32.mrf.mxu1 }
 0x1c7   :  { %v411_v7 = vadd.f32 %v774_v3, %v410_v4  ;;  %v439_v11 = vmax.f32 %v419_v5, 0.0  ;;  %v445_v37 = vpack.c.bf16 %v434_v32, %v433_v34 }
 0x1c8   :  { %v919_v6 = vpop.f32.mrf.mxu1 }
 0x1c9   :  { %v422_v8 = vadd.f32 %v919_v6, %v774_v3  ;;  %v437_v22 = vmax.f32 %v411_v7, 0.0 }
 0x1ca   :  { %v413_v9 = vpop.f32.mrf.mxu1 }
 0x1cb   :  { %v440_v12 = vmax.f32 %v422_v8, 0.0  ;;  %v414_v13 = vadd.f32 %v774_v3, %v413_v9  ;;  %v783_v9 = vld [vmem:[%s1234_s5] ss:$0 sm:$0xff] }
 0x1cd   :  { %v448_v23 = vpack.c.bf16 %v440_v12, %v439_v11  ;;  %v438_v24 = vmax.f32 %v414_v13, 0.0 }
 0x1cf   :  { %v447_v27 = vpack.c.bf16 %v438_v24, %v437_v22  ;;  %920 = vmatprep.subr.bf16.mxu0 %v448_v23 }
 0x1d0   :  { %921 = vmatpush3.bf16.msra.mxu0 %v448_v23 }
 0x1d1   :  { %922 = vmatprep.subr.bf16.mxu0 %v447_v27 }
 0x1d4   :  { %923 = vmatpush3.bf16.msra.mxu0 %v447_v27 }
 0x1d5   :  { %924 = vmatprep.subr.bf16.mxu0 %v446_v31 }
 0x1d8   :  { %925 = vmatpush3.bf16.msra.mxu0 %v446_v31 }
 0x1d9   :  { %926 = vmatprep.subr.bf16.mxu0 %v445_v37 }
 0x1dc   :  { %927 = vmatpush3.bf16.msra.mxu0 %v445_v37 }
 0x1dd   :  { %928 = vmatprep.subr.bf16.mxu0 %v444_v41 }
 0x1e0   :  { %929 = vmatpush3.bf16.msra.mxu0 %v444_v41 }
 0x1e1   :  { %930 = vmatprep.subr.bf16.mxu0 %v443_v47 }
 0x1e4   :  { %931 = vmatpush3.bf16.msra.mxu0 %v443_v47 }
 0x1e5   :  { %932 = vmatprep.subr.bf16.mxu0 %v442_v50 }
 0x1e8   :  { %933 = vmatpush3.bf16.msra.mxu0 %v442_v50 }
 0x1e9   :  { %934 = vmatprep.subr.bf16.mxu0 %v441_v53 }
 0x1ec   :  { %935 = vmatpush3.bf16.msra.mxu0 %v441_v53 }
 0x1ef   :  { %937 = vmatmul.mubr.bf16.vlgmr.msra.gmra.mxu0 %v1096_v14  ;;  %v1015_v14 = vld [vmem:[%s1232_s4] sm:$0xff]  }
 0x1f0   :  { %940 = vmatprep.mubr.bf16.mxu0 %v1101_v15  ;;  %966 = vmatprep.subr.bf16.mxu1 %v1015_v14 }
 0x1f1   :  { %967 = vmatpush3.bf16.msra.mxu1 %v1015_v14 }
 0x1f7   :  { %941 = vmatmul.mubr.bf16.gmra.mxu0 %v1111_v17 }
 0x1f8   :  { %944 = vmatprep.mubr.bf16.mxu0 %v1116_v18 }
 0x1ff   :  { %945 = vmatmul.mubr.bf16.gmra.mxu0 %v1123_v19 }
 0x200   :  { %948 = vmatprep.mubr.bf16.mxu0 %v1128_v20 }
 0x207   :  { %949 = vmatmul.mubr.bf16.gmra.mxu0 %v1135_v21 }
 0x2af   :  { %v938_v15 = vpop.f32.mrf.mxu0 }
 0x2b1   :  { %v483_v17 = vpop.f32.mrf.mxu0 }
 0x2b3   :  { %v939_v18 = vpop.f32.mrf.mxu0 }
 0x2b4   :  { %v547_v20 = vpack.c.bf16 %v939_v18, %v938_v15 }
 0x2b5   :  { %v486_v19 = vpop.f32.mrf.mxu0 }
 0x2b6   :  { %v546_v55 = vpack.c.bf16 %v486_v19, %v483_v17 }
 0x2b7   :  { %v942_v56 = vpop.f32.mrf.mxu0 }
 0x2b8   :  { %968 = vmatprep.mubr.bf16.mxu1 %v546_v55 }
 0x2b9   :  { %v499_v21 = vpop.f32.mrf.mxu0  ;;  %969 = vmatmul.mubr.bf16.vlgmr.msra.gmra.mxu1 %v547_v20 }
 0x2bb   :  { %v943_v57 = vpop.f32.mrf.mxu0 }
 0x2bc   :  { %v549_v60 = vpack.c.bf16 %v943_v57, %v942_v56 }
 0x2bd   :  { %v502_v58 = vpop.f32.mrf.mxu0 }
 0x2be   :  { %v548_v59 = vpack.c.bf16 %v502_v58, %v499_v21 }
 0x2bf   :  { %v946_v61 = vpop.f32.mrf.mxu0 }
 0x2c0   :  { %972 = vmatprep.mubr.bf16.mxu1 %v548_v59 }
 0x2c1   :  { %v515_v62 = vpop.f32.mrf.mxu0  ;;  %973 = vmatmul.mubr.bf16.gmra.mxu1 %v549_v60 }
 0x2c3   :  { %v947_v63 = vpop.f32.mrf.mxu0 }
 0x2c4   :  { %v551_v2 = vpack.c.bf16 %v947_v63, %v946_v61 }
 0x2c5   :  { %v518_v0 = vpop.f32.mrf.mxu0 }
 0x2c6   :  { %v550_v1 = vpack.c.bf16 %v518_v0, %v515_v62 }
 0x2c7   :  { %v950_v3 = vpop.f32.mrf.mxu0 }
 0x2c8   :  { %976 = vmatprep.mubr.bf16.mxu1 %v550_v1 }
 0x2c9   :  { %v531_v4 = vpop.f32.mrf.mxu0  ;;  %977 = vmatmul.mubr.bf16.gmra.mxu1 %v551_v2 }
 0x2cb   :  { %v951_v5 = vpop.f32.mrf.mxu0 }
 0x2cc   :  { %v553_v8 = vpack.c.bf16 %v951_v5, %v950_v3 }
 0x2cd   :  { %v534_v6 = vpop.f32.mrf.mxu0 }
 0x2ce   :  { %v552_v7 = vpack.c.bf16 %v534_v6, %v531_v4 }
 0x2d0   :  { %980 = vmatprep.mubr.bf16.mxu1 %v552_v7 }
 0x2d1   :  { %981 = vmatmul.mubr.bf16.gmra.mxu1 %v553_v8 }
 0x379   :  { %v970_v10 = vpop.f32.mrf.mxu1 }
 0x37a   :  { %v668_v11 = vadd.f32 %v970_v10, %v783_v9 }
 0x37b   :  { %v659_v12 = vpop.f32.mrf.mxu1 }
 0x37c   :  { %v724_v13 = vmax.f32 %v668_v11, 0.0  ;;  %v660_v16 = vadd.f32 %v783_v9, %v659_v12 }
 0x37d   :  { %v971_v22 = vpop.f32.mrf.mxu1 }
 0x37e   :  { %740 = vst [vmem:[%s1235_s6 + $0x10] sm:$0xff] %v724_v13  ;;  %v722_v23 = vmax.f32 %v660_v16, 0.0  ;;  %v671_v24 = vadd.f32 %v971_v22, %v783_v9 }
 0x37f   :  { %v662_v25 = vpop.f32.mrf.mxu1 }
 0x380   :  { %738 = vst [vmem:[%s1235_s6] sm:$0xff] %v722_v23  ;;  %v725_v26 = vmax.f32 %v671_v24, 0.0  ;;  %v663_v27 = vadd.f32 %v783_v9, %v662_v25 }
 0x381   :  { %v974_v28 = vpop.f32.mrf.mxu1 }
 0x382   :  { %741 = vst [vmem:[%s1235_s6 + $0x18] sm:$0xff] %v725_v26  ;;  %v723_v29 = vmax.f32 %v663_v27, 0.0  ;;  %v684_v30 = vadd.f32 %v974_v28, %v783_v9 }
 0x383   :  { %v675_v31 = vpop.f32.mrf.mxu1 }
 0x384   :  { %739 = vst [vmem:[%s1235_s6 + $0x8] sm:$0xff] %v723_v29  ;;  %v728_v32 = vmax.f32 %v684_v30, 0.0  ;;  %v676_v33 = vadd.f32 %v783_v9, %v675_v31 }
 0x385   :  { %v975_v34 = vpop.f32.mrf.mxu1 }
 0x386   :  { %744 = vst [vmem:[%s1235_s6 + $0x30] sm:$0xff] %v728_v32  ;;  %v726_v35 = vmax.f32 %v676_v33, 0.0  ;;  %v687_v36 = vadd.f32 %v975_v34, %v783_v9 }
 0x387   :  { %v678_v37 = vpop.f32.mrf.mxu1 }
 0x388   :  { %742 = vst [vmem:[%s1235_s6 + $0x20] sm:$0xff] %v726_v35  ;;  %v729_v38 = vmax.f32 %v687_v36, 0.0  ;;  %v679_v39 = vadd.f32 %v783_v9, %v678_v37 }
 0x389   :  { %v978_v40 = vpop.f32.mrf.mxu1 }
 0x38a   :  { %745 = vst [vmem:[%s1235_s6 + $0x38] sm:$0xff] %v729_v38  ;;  %v727_v41 = vmax.f32 %v679_v39, 0.0  ;;  %v700_v42 = vadd.f32 %v978_v40, %v783_v9 }
 0x38b   :  { %v691_v43 = vpop.f32.mrf.mxu1 }
 0x38c   :  { %743 = vst [vmem:[%s1235_s6 + $0x28] sm:$0xff] %v727_v41  ;;  %v732_v44 = vmax.f32 %v700_v42, 0.0  ;;  %v692_v45 = vadd.f32 %v783_v9, %v691_v43 }
 0x38d   :  { %v979_v46 = vpop.f32.mrf.mxu1 }
 0x38e   :  { %748 = vst [vmem:[%s1235_s6 + $0x50] sm:$0xff] %v732_v44  ;;  %v730_v47 = vmax.f32 %v692_v45, 0.0  ;;  %v703_v48 = vadd.f32 %v979_v46, %v783_v9 }
 0x38f   :  { %v694_v49 = vpop.f32.mrf.mxu1 }
 0x390   :  { %746 = vst [vmem:[%s1235_s6 + $0x40] sm:$0xff] %v730_v47  ;;  %v733_v50 = vmax.f32 %v703_v48, 0.0  ;;  %v695_v51 = vadd.f32 %v783_v9, %v694_v49 }
 0x391   :  { %v982_v52 = vpop.f32.mrf.mxu1 }
 0x392   :  { %749 = vst [vmem:[%s1235_s6 + $0x58] sm:$0xff] %v733_v50  ;;  %v731_v53 = vmax.f32 %v695_v51, 0.0  ;;  %v716_v54 = vadd.f32 %v982_v52, %v783_v9 }
 0x393   :  { %v707_v14 = vpop.f32.mrf.mxu1 }
 0x394   :  { %747 = vst [vmem:[%s1235_s6 + $0x48] sm:$0xff] %v731_v53  ;;  %v736_v15 = vmax.f32 %v716_v54, 0.0  ;;  %v708_v17 = vadd.f32 %v783_v9, %v707_v14 }
 0x395   :  { %v983_v18 = vpop.f32.mrf.mxu1 }
 0x396   :  { %752 = vst [vmem:[%s1235_s6 + $0x70] sm:$0xff] %v736_v15  ;;  %v734_v19 = vmax.f32 %v708_v17, 0.0  ;;  %v719_v55 = vadd.f32 %v983_v18, %v783_v9 }
 0x397   :  { %v710_v20 = vpop.f32.mrf.mxu1 }
 0x398   :  { %750 = vst [vmem:[%s1235_s6 + $0x60] sm:$0xff] %v734_v19  ;;  %v737_v56 = vmax.f32 %v719_v55, 0.0  ;;  %v711_v21 = vadd.f32 %v783_v9, %v710_v20 }
 0x39a   :  { %753 = vst [vmem:[%s1235_s6 + $0x78] sm:$0xff] %v737_v56  ;;  %v735_v57 = vmax.f32 %v711_v21, 0.0 }
 0x39c   :  { %751 = vst [vmem:[%s1235_s6 + $0x68] sm:$0xff] %v735_v57 }

</bundles_post_ra>
